<compile_context>
chip_gen: v7x
topology: tpu7x:2x2x1
jax: 0.10.0
libtpu: 0.0.40
codegen_flags: <defaults>
</compile_context>

<pallas_src>
import math

import jax
import jax.numpy as jnp
from jax.experimental import pallas as pl
from jax.experimental.pallas import tpu as pltpu


def _round_up(x: int, m: int) -> int:
    return (x + m - 1) // m * m


def _film_stacked_kernel(t_ref, freq_ref, w1s_ref, w1c_ref, b1_ref,
                         w2s_ref, w2c_ref, b2s_ref, b2c_ref,
                         scale_ref, shift_ref):
    mm_dtype = w1s_ref.dtype

    # Sinusoidal embedding (f32; sin/cos go to the EUP).
    t = t_ref[...]                              # (tb, 1) f32
    arg = t * freq_ref[...]                     # (tb, half_p) via lane broadcast
    s = jnp.sin(arg)
    c = jnp.cos(arg)

    # Layer 1: [sin | cos] @ W1 folded as sin @ W1_top + cos @ W1_bot.
    h = jnp.dot(s.astype(mm_dtype), w1s_ref[...], preferred_element_type=jnp.float32)
    h = h + jnp.dot(c.astype(mm_dtype), w1c_ref[...], preferred_element_type=jnp.float32)
    h = h + b1_ref[...]                         # f32 bias add
    h = h * jax.nn.sigmoid(h)                   # SiLU in f32 (sigmoid -> EUP)

    # Layer 2: W2 split column-wise into the scale / shift halves.
    hb = h.astype(mm_dtype)
    scale = jnp.dot(hb, w2s_ref[...], preferred_element_type=jnp.float32) + b2s_ref[...]
    shift = jnp.dot(hb, w2c_ref[...], preferred_element_type=jnp.float32) + b2c_ref[...]

    scale_ref[...] = scale.astype(scale_ref.dtype)
    shift_ref[...] = shift.astype(shift_ref.dtype)


def film_stacked_embedding(timesteps, w1, b1, w2, b2, *, dim,
                           mm_dtype=jnp.bfloat16):
    """Fused SinusoidalTimeEmbedding + FiLM MLP. Returns (scale, shift), (B, dim) each."""
    B = timesteps.shape[0]
    hidden = w1.shape[1]
    half = dim // 2
    assert dim % 2 == 0 and half >= 2
    assert w1.shape == (dim, hidden)
    assert b1.shape == (hidden,)
    assert w2.shape == (hidden, 2 * dim)
    assert b2.shape == (2 * dim,)

    f32 = jnp.float32
    # ---- padded, lane-dense parameter layout (host-side, one-time) ----
    half_p = _round_up(half, 128)
    hidden_p = _round_up(hidden, 128)
    dim_p = _round_up(dim, 128)

    freqs = jnp.exp(jnp.arange(half, dtype=f32) * (-math.log(10000.0) / (half - 1)))
    freq_row = jnp.zeros((1, half_p), f32).at[0, :half].set(freqs)

    def pad2(x, rows, cols, dtype):
        out = jnp.zeros((rows, cols), dtype)
        return out.at[:x.shape[0], :x.shape[1]].set(x.astype(dtype))

    w1s = pad2(w1[:half, :], half_p, hidden_p, mm_dtype)       # sin rows of W1
    w1c = pad2(w1[half:, :], half_p, hidden_p, mm_dtype)       # cos rows of W1
    b1p = pad2(b1.reshape(1, hidden), 1, hidden_p, f32)
    w2s = pad2(w2[:, :dim], hidden_p, dim_p, mm_dtype)         # scale columns
    w2c = pad2(w2[:, dim:], hidden_p, dim_p, mm_dtype)         # shift columns
    b2_2d = b2.reshape(1, 2 * dim)
    b2s = pad2(b2_2d[:, :dim], 1, dim_p, f32)
    b2c = pad2(b2_2d[:, dim:], 1, dim_p, f32)

    # ---- batch tiling (sublane-aligned); grid axis is "parallel" ----
    tb = _round_up(B, 8) if B <= 256 else 256
    B_pad = _round_up(B, tb)
    t_col = jnp.zeros((B_pad, 1), f32).at[:B, 0].set(timesteps.astype(f32))

    grid = (B_pad // tb,)
    batch_map = lambda i: (i, 0)
    resident = lambda i: (0, 0)     # weights/biases stay in VMEM across batch tiles

    in_specs = [
        pl.BlockSpec((tb, 1), batch_map),
        pl.BlockSpec((1, half_p), resident),
        pl.BlockSpec((half_p, hidden_p), resident),
        pl.BlockSpec((half_p, hidden_p), resident),
        pl.BlockSpec((1, hidden_p), resident),
        pl.BlockSpec((hidden_p, dim_p), resident),
        pl.BlockSpec((hidden_p, dim_p), resident),
        pl.BlockSpec((1, dim_p), resident),
        pl.BlockSpec((1, dim_p), resident),
    ]
    out_specs = (
        pl.BlockSpec((tb, dim_p), batch_map),
        pl.BlockSpec((tb, dim_p), batch_map),
    )
    out_shape = (
        jax.ShapeDtypeStruct((B_pad, dim_p), f32),
        jax.ShapeDtypeStruct((B_pad, dim_p), f32),
    )

    # Explicit VMEM budget: double-buffered blocks + slack (never below default).
    def nbytes(shape, dtype):
        return math.prod(shape) * jnp.dtype(dtype).itemsize

    block_bytes = (
        nbytes((tb, 1), f32) + nbytes((1, half_p), f32)
        + 2 * nbytes((half_p, hidden_p), mm_dtype)
        + nbytes((1, hidden_p), f32)
        + 2 * nbytes((hidden_p, dim_p), mm_dtype)
        + 2 * nbytes((1, dim_p), f32)
        + 2 * nbytes((tb, dim_p), f32)
    )
    vmem_limit = max(2 * block_bytes + (1 << 20), 32 * 1024 * 1024)

    scale_p, shift_p = pl.pallas_call(
        _film_stacked_kernel,
        grid=grid,
        in_specs=in_specs,
        out_specs=out_specs,
        out_shape=out_shape,
        compiler_params=pltpu.CompilerParams(
            dimension_semantics=("parallel",),
            vmem_limit_bytes=int(vmem_limit),
        ),
    )(t_col, freq_row, w1s, w1c, b1p, w2s, w2c, b2s, b2c)

    if B_pad == B and dim_p == dim:
        return scale_p, shift_p
    # Only needed when dim / B are not already lane/sublane aligned (demo shapes).
    return scale_p[:B, :dim], shift_p[:B, :dim]


def init_params(key, dim, hidden_dim, dtype=jnp.float32):
    """Deterministic init matching nn.Linear shapes (weights stored transposed)."""
    k1, k2, k3, k4 = jax.random.split(key, 4)
    bound1 = 1.0 / math.sqrt(dim)
    bound2 = 1.0 / math.sqrt(hidden_dim)
    w1 = jax.random.uniform(k1, (dim, hidden_dim), dtype, -bound1, bound1)
    b1 = jax.random.uniform(k2, (hidden_dim,), dtype, -bound1, bound1)
    w2 = jax.random.uniform(k3, (hidden_dim, 2 * dim), dtype, -bound2, bound2)
    b2 = jax.random.uniform(k4, (2 * dim,), dtype, -bound2, bound2)
    return w1, b1, w2, b2


def reference(timesteps, w1, b1, w2, b2, dim):
    """Pure-JAX f32 reference of FiLMStackedEmbedding.forward."""
    half = dim // 2
    freqs = jnp.exp(jnp.arange(half, dtype=jnp.float32) * (-math.log(10000.0) / (half - 1)))
    arg = timesteps.astype(jnp.float32)[:, None] * freqs[None, :]
    t_emb = jnp.concatenate([jnp.sin(arg), jnp.cos(arg)], axis=-1)
    h = t_emb @ w1 + b1
    h = h * jax.nn.sigmoid(h)
    out = h @ w2 + b2
    return out[:, :dim], out[:, dim:]


if __name__ == "__main__":
    B, dim, hidden_dim = 8, 32, 64  # small synthetic shapes

    key = jax.random.PRNGKey(0)
    k_t, k_p = jax.random.split(key)
    timesteps = jax.random.uniform(k_t, (B,), jnp.float32, 0.0, 1000.0)
    w1, b1, w2, b2 = init_params(k_p, dim, hidden_dim)

    scale, shift = film_stacked_embedding(timesteps, w1, b1, w2, b2, dim=dim)
    jax.block_until_ready((scale, shift))

    ref_scale, ref_shift = reference(timesteps, w1, b1, w2, b2, dim)
    assert scale.shape == (B, dim) and shift.shape == (B, dim)
    # bf16 matmul inputs + f32 accumulation vs. the pure-f32 reference.
    assert jnp.allclose(scale, ref_scale, atol=5e-2, rtol=5e-2), \
        float(jnp.max(jnp.abs(scale - ref_scale)))
    assert jnp.allclose(shift, ref_shift, atol=5e-2, rtol=5e-2), \
        float(jnp.max(jnp.abs(shift - ref_shift)))

    print("KERNEL_OK")
</pallas_src>

<mosaic_0001>
module attributes {stable_mosaic.version = 11 : i64} {
  func.func @_film_stacked_kernel(%arg0: i32, %arg1: memref<8x1xf32, #tpu.memory_space<vmem>>, %arg2: memref<1x128xf32, #tpu.memory_space<vmem>>, %arg3: memref<128x128xbf16, #tpu.memory_space<vmem>>, %arg4: memref<128x128xbf16, #tpu.memory_space<vmem>>, %arg5: memref<1x128xf32, #tpu.memory_space<vmem>>, %arg6: memref<128x128xbf16, #tpu.memory_space<vmem>>, %arg7: memref<128x128xbf16, #tpu.memory_space<vmem>>, %arg8: memref<1x128xf32, #tpu.memory_space<vmem>>, %arg9: memref<1x128xf32, #tpu.memory_space<vmem>>, %arg10: memref<8x128xf32, #tpu.memory_space<vmem>>, %arg11: memref<8x128xf32, #tpu.memory_space<vmem>>) attributes {dimension_semantics = [#tpu.dimension_semantics<parallel>], iteration_bounds = array<i64: 1>, scalar_prefetch = 0 : i64, scratch_operands = 0 : i64, tpu.core_type = #tpu.core_type<tc>, window_params = [{transform_indices = @transform_0, window_bounds = array<i64: 8, 1>}, {pipeline_mode = #tpu.pipeline_mode<synchronous>, transform_indices = @transform_1, window_bounds = array<i64: 1, 128>}, {pipeline_mode = #tpu.pipeline_mode<synchronous>, transform_indices = @transform_2, window_bounds = array<i64: 128, 128>}, {pipeline_mode = #tpu.pipeline_mode<synchronous>, transform_indices = @transform_3, window_bounds = array<i64: 128, 128>}, {pipeline_mode = #tpu.pipeline_mode<synchronous>, transform_indices = @transform_4, window_bounds = array<i64: 1, 128>}, {pipeline_mode = #tpu.pipeline_mode<synchronous>, transform_indices = @transform_5, window_bounds = array<i64: 128, 128>}, {pipeline_mode = #tpu.pipeline_mode<synchronous>, transform_indices = @transform_6, window_bounds = array<i64: 128, 128>}, {pipeline_mode = #tpu.pipeline_mode<synchronous>, transform_indices = @transform_7, window_bounds = array<i64: 1, 128>}, {pipeline_mode = #tpu.pipeline_mode<synchronous>, transform_indices = @transform_8, window_bounds = array<i64: 1, 128>}, {transform_indices = @transform_9, window_bounds = array<i64: 8, 128>}, {transform_indices = @transform_10, window_bounds = array<i64: 8, 128>}]} {
    %c0 = arith.constant 0 : index
    %c0_0 = arith.constant 0 : index
    %0 = vector.load %arg1[%c0, %c0_0] : memref<8x1xf32, #tpu.memory_space<vmem>>, vector<8x1xf32>
    %c0_1 = arith.constant 0 : index
    %c0_2 = arith.constant 0 : index
    %1 = vector.load %arg2[%c0_1, %c0_2] : memref<1x128xf32, #tpu.memory_space<vmem>>, vector<1x128xf32>
    %2 = vector.broadcast %0 : vector<8x1xf32> to vector<8x128xf32>
    %3 = vector.broadcast %1 : vector<1x128xf32> to vector<8x128xf32>
    %4 = arith.mulf %2, %3 : vector<8x128xf32>
    %5 = math.sin %4 : vector<8x128xf32>
    %6 = math.cos %4 : vector<8x128xf32>
    %7 = arith.truncf %5 : vector<8x128xf32> to vector<8x128xbf16>
    %c0_3 = arith.constant 0 : index
    %c0_4 = arith.constant 0 : index
    %8 = vector.load %arg3[%c0_3, %c0_4] : memref<128x128xbf16, #tpu.memory_space<vmem>>, vector<128x128xbf16>
    %cst = arith.constant dense<0.000000e+00> : vector<8x128xf32>
    %9 = tpu.matmul %7, %8, %cst {dimension_numbers = #tpu.dot_dimension_numbers<[1], [0], [0], [1], [0, 0, 1, 1], [], []>} : vector<8x128xbf16>, vector<128x128xbf16>, vector<8x128xf32> -> vector<8x128xf32>
    %10 = arith.truncf %6 : vector<8x128xf32> to vector<8x128xbf16>
    %c0_5 = arith.constant 0 : index
    %c0_6 = arith.constant 0 : index
    %11 = vector.load %arg4[%c0_5, %c0_6] : memref<128x128xbf16, #tpu.memory_space<vmem>>, vector<128x128xbf16>
    %cst_7 = arith.constant dense<0.000000e+00> : vector<8x128xf32>
    %12 = tpu.matmul %10, %11, %cst_7 {dimension_numbers = #tpu.dot_dimension_numbers<[1], [0], [0], [1], [0, 0, 1, 1], [], []>} : vector<8x128xbf16>, vector<128x128xbf16>, vector<8x128xf32> -> vector<8x128xf32>
    %13 = arith.addf %9, %12 : vector<8x128xf32>
    %c0_8 = arith.constant 0 : index
    %c0_9 = arith.constant 0 : index
    %14 = vector.load %arg5[%c0_8, %c0_9] : memref<1x128xf32, #tpu.memory_space<vmem>>, vector<1x128xf32>
    %15 = vector.broadcast %14 : vector<1x128xf32> to vector<8x128xf32>
    %16 = arith.addf %13, %15 : vector<8x128xf32>
    %17 = arith.negf %16 : vector<8x128xf32>
    %18 = math.exp %17 : vector<8x128xf32>
    %cst_10 = arith.constant 1.000000e+00 : f32
    %19 = vector.broadcast %cst_10 : f32 to vector<8x128xf32>
    %20 = arith.addf %19, %18 : vector<8x128xf32>
    %21 = arith.divf %19, %20 : vector<8x128xf32>
    %22 = arith.mulf %16, %21 : vector<8x128xf32>
    %23 = arith.truncf %22 : vector<8x128xf32> to vector<8x128xbf16>
    %c0_11 = arith.constant 0 : index
    %c0_12 = arith.constant 0 : index
    %24 = vector.load %arg6[%c0_11, %c0_12] : memref<128x128xbf16, #tpu.memory_space<vmem>>, vector<128x128xbf16>
    %cst_13 = arith.constant dense<0.000000e+00> : vector<8x128xf32>
    %25 = tpu.matmul %23, %24, %cst_13 {dimension_numbers = #tpu.dot_dimension_numbers<[1], [0], [0], [1], [0, 0, 1, 1], [], []>} : vector<8x128xbf16>, vector<128x128xbf16>, vector<8x128xf32> -> vector<8x128xf32>
    %c0_14 = arith.constant 0 : index
    %c0_15 = arith.constant 0 : index
    %26 = vector.load %arg8[%c0_14, %c0_15] : memref<1x128xf32, #tpu.memory_space<vmem>>, vector<1x128xf32>
    %27 = vector.broadcast %26 : vector<1x128xf32> to vector<8x128xf32>
    %28 = arith.addf %25, %27 : vector<8x128xf32>
    %c0_16 = arith.constant 0 : index
    %c0_17 = arith.constant 0 : index
    %29 = vector.load %arg7[%c0_16, %c0_17] : memref<128x128xbf16, #tpu.memory_space<vmem>>, vector<128x128xbf16>
    %cst_18 = arith.constant dense<0.000000e+00> : vector<8x128xf32>
    %30 = tpu.matmul %23, %29, %cst_18 {dimension_numbers = #tpu.dot_dimension_numbers<[1], [0], [0], [1], [0, 0, 1, 1], [], []>} : vector<8x128xbf16>, vector<128x128xbf16>, vector<8x128xf32> -> vector<8x128xf32>
    %c0_19 = arith.constant 0 : index
    %c0_20 = arith.constant 0 : index
    %31 = vector.load %arg9[%c0_19, %c0_20] : memref<1x128xf32, #tpu.memory_space<vmem>>, vector<1x128xf32>
    %32 = vector.broadcast %31 : vector<1x128xf32> to vector<8x128xf32>
    %33 = arith.addf %30, %32 : vector<8x128xf32>
    %c0_21 = arith.constant 0 : index
    %c0_22 = arith.constant 0 : index
    %34 = vector.load %arg10[%c0_21, %c0_22] : memref<8x128xf32, #tpu.memory_space<vmem>>, vector<8x128xf32>
    tpu.vector_store %arg10[%c0_21, %c0_22], %28 {strides = array<i32>} : memref<8x128xf32, #tpu.memory_space<vmem>>, vector<8x128xf32>,
    %c0_23 = arith.constant 0 : index
    %c0_24 = arith.constant 0 : index
    %35 = vector.load %arg11[%c0_23, %c0_24] : memref<8x128xf32, #tpu.memory_space<vmem>>, vector<8x128xf32>
    tpu.vector_store %arg11[%c0_23, %c0_24], %33 {strides = array<i32>} : memref<8x128xf32, #tpu.memory_space<vmem>>, vector<8x128xf32>,
    return
  }
  func.func @transform_0(%arg0: i32) -> (i32, i32) {
    %c0_i32 = arith.constant 0 : i32
    %c0_i32_0 = arith.constant 0 : i32
    return %arg0, %c0_i32 : i32, i32
  }
  func.func @transform_1(%arg0: i32) -> (i32, i32) {
    %c0_i32 = arith.constant 0 : i32
    %c0_i32_0 = arith.constant 0 : i32
    %c0_i32_1 = arith.constant 0 : i32
    return %c0_i32, %c0_i32_0 : i32, i32
  }
  func.func @transform_2(%arg0: i32) -> (i32, i32) {
    %c0_i32 = arith.constant 0 : i32
    %c0_i32_0 = arith.constant 0 : i32
    %c0_i32_1 = arith.constant 0 : i32
    return %c0_i32, %c0_i32_0 : i32, i32
  }
  func.func @transform_3(%arg0: i32) -> (i32, i32) {
    %c0_i32 = arith.constant 0 : i32
    %c0_i32_0 = arith.constant 0 : i32
    %c0_i32_1 = arith.constant 0 : i32
    return %c0_i32, %c0_i32_0 : i32, i32
  }
  func.func @transform_4(%arg0: i32) -> (i32, i32) {
    %c0_i32 = arith.constant 0 : i32
    %c0_i32_0 = arith.constant 0 : i32
    %c0_i32_1 = arith.constant 0 : i32
    return %c0_i32, %c0_i32_0 : i32, i32
  }
  func.func @transform_5(%arg0: i32) -> (i32, i32) {
    %c0_i32 = arith.constant 0 : i32
    %c0_i32_0 = arith.constant 0 : i32
    %c0_i32_1 = arith.constant 0 : i32
    return %c0_i32, %c0_i32_0 : i32, i32
  }
  func.func @transform_6(%arg0: i32) -> (i32, i32) {
    %c0_i32 = arith.constant 0 : i32
    %c0_i32_0 = arith.constant 0 : i32
    %c0_i32_1 = arith.constant 0 : i32
    return %c0_i32, %c0_i32_0 : i32, i32
  }
  func.func @transform_7(%arg0: i32) -> (i32, i32) {
    %c0_i32 = arith.constant 0 : i32
    %c0_i32_0 = arith.constant 0 : i32
    %c0_i32_1 = arith.constant 0 : i32
    return %c0_i32, %c0_i32_0 : i32, i32
  }
  func.func @transform_8(%arg0: i32) -> (i32, i32) {
    %c0_i32 = arith.constant 0 : i32
    %c0_i32_0 = arith.constant 0 : i32
    %c0_i32_1 = arith.constant 0 : i32
    return %c0_i32, %c0_i32_0 : i32, i32
  }
  func.func @transform_9(%arg0: i32) -> (i32, i32) {
    %c0_i32 = arith.constant 0 : i32
    %c0_i32_0 = arith.constant 0 : i32
    return %arg0, %c0_i32 : i32, i32
  }
  func.func @transform_10(%arg0: i32) -> (i32, i32) {
    %c0_i32 = arith.constant 0 : i32
    %c0_i32_0 = arith.constant 0 : i32
    return %arg0, %c0_i32 : i32, i32
  }
}

</mosaic_0001>

<bundles_post_ra>
// kernel: tpu_custom_call.1
= control target key start
LH: loop header
LB: loop body
LE: loop exit
PB: predicated region body
PF: predicated region fallthrough
CT: control target
= control target key end

     0   :  { %16 = vsyncpa [#allocation3], 0  ;;  %s1412_s0 = inlined_call_operand.vmem [shape: f32[8,1], index: 0, kind: input, shape index: {}]   ;;  %s1413_s1 = inlined_call_operand.vmem [shape: f32[1,128], index: 1, kind: input, shape index: {}]   ;;  %s1414_s2 = inlined_call_operand.hbm [shape: bf16[128,128], index: 2, kind: input, shape index: {}]   ;;  %s1415_s3 = inlined_call_operand.hbm [shape: bf16[128,128], index: 3, kind: input, shape index: {}]   ;;  %s1416_s4 = inlined_call_operand.vmem [shape: f32[1,128], index: 4, kind: input, shape index: {}]   ;;  %s1417_s5 = inlined_call_operand.hbm [shape: bf16[128,128], index: 5, kind: input, shape index: {}]   ;;  %s1418_s6 = inlined_call_operand.hbm [shape: bf16[128,128], index: 6, kind: input, shape index: {}]   ;;  %s1419_s7 = inlined_call_operand.vmem [shape: f32[1,128], index: 7, kind: input, shape index: {}]   ;;  %s1420_s8 = inlined_call_operand.vmem [shape: f32[1,128], index: 8, kind: input, shape index: {}]   ;;  %s1421_s9 = inlined_call_operand.hbm [shape: f32[8,128], index: 9, kind: output, shape index: {0}]   ;;  %s1422_s10 = inlined_call_operand.hbm [shape: f32[8,128], index: 10, kind: output, shape index: {1}]  }
   0x1   :  { %17 = vsyncpa [#allocation6], 0 }
   0x2   :  { %18 = vsyncpa [#allocation9], 0 }
   0x3   :  { %19 = vsyncpa [#allocation4], 0 }
   0x4   :  { %20 = vsyncpa [#allocation12], 0  ;;  %s1159_s13 = smov [#allocation5]   ;;  %s1160_s15 = smov [#allocation2]  }
   0x5   :  { %s42_s14 = sshll.u32 %s1159_s13, 4  ;;  %s30_s16 = sshll.u32 %s1160_s15, 4  ;;  %s43_s14 = int_to_ptr.vmem [resolvable:$true] %s42_s14  ;;  %s1231_s16 = int_to_ptr.vmem [resolvable:$true] %s30_s16 }
   0x6   :  { %s1017_s19 = scalar_lea.hbm %s1415_s3, 1024 }
   0x7   :  { %p1018_p0 = scmp.ne.s32.totalorder %s1415_s3, %s1017_s19  ;;  %p1021_p1 = scmp.lt.u32.totalorder %s1017_s19, %s1415_s3 }
   0x9   :  { %p1023_p2 = pnand %p1021_p1, %p1018_p0 }
   0xb   :  { %1026 = shalt.err (!%p1023_p2)
}
   0xc   :  { %s1027_s24 = scalar_lea.vmem %s43_s14, 1024  ;;  %p1032_p4 = scmp.lt.s32.totalorder %s43_s14, %s43_s14 }
   0xd   :  { %p1028_p3 = scmp.ne.s32.totalorder %s43_s14, %s1027_s24  ;;  %p1033_p5 = scmp.lt.s32.totalorder %s1027_s24, %s1027_s24 }
   0xf   :  { %p1034_p6 = por %p1033_p5, %p1032_p4 }
  0x11   :  { %p1035_p7 = pnand %p1034_p6, %p1028_p3 }
  0x13   :  { %1038 = shalt.err (!%p1035_p7)
}
  0x14   :  { %s1161_s25 = smov 64   ;;  %s1162_s26 = smov 4  }
  0x15   :  { %48 = dma.hbm_to_vmem [thread:$0]  %s1415_s3, 1024, %s43_s14, [#allocation6], %s1161_s25, %s1161_s25, %s1162_s26  }
  0x16   :  { %s1039_s11 = scalar_lea.hbm %s1414_s2, 1024 }
  0x17   :  { %p1040_p8 = scmp.ne.s32.totalorder %s1414_s2, %s1039_s11  ;;  %p1043_p9 = scmp.lt.u32.totalorder %s1039_s11, %s1414_s2 }
  0x19   :  { %p1045_p10 = pnand %p1043_p9, %p1040_p8 }
  0x1b   :  { %1048 = shalt.err (!%p1045_p10)
}
  0x1c   :  { %s1049_s18 = scalar_lea.vmem %s1231_s16, 1024  ;;  %p1054_p12 = scmp.lt.s32.totalorder %s1231_s16, %s1231_s16 }
  0x1d   :  { %p1050_p11 = scmp.ne.s32.totalorder %s1231_s16, %s1049_s18  ;;  %p1055_p13 = scmp.lt.s32.totalorder %s1049_s18, %s1049_s18 }
  0x1f   :  { %p1056_p0 = por %p1055_p13, %p1054_p12 }
  0x21   :  { %p1057_p1 = pnand %p1056_p0, %p1050_p11 }
  0x23   :  { %1060 = shalt.err (!%p1057_p1)
}
  0x24   :  { %36 = dma.hbm_to_vmem [thread:$0]  %s1414_s2, 1024, %s1231_s16, [#allocation3], %s1161_s25, %s1161_s25, %s1162_s26  }
  0x25   :  { %s1163_s19 = smov [#allocation7]   ;;  %s1164_s21 = smov [#allocation8]  }
  0x26   :  { %s56_s20 = sshll.u32 %s1163_s19, 4  ;;  %s68_s22 = sshll.u32 %s1164_s21, 4  ;;  %s57_s20 = int_to_ptr.vmem [resolvable:$true] %s56_s20  ;;  %s1268_s22 = int_to_ptr.vmem [resolvable:$true] %s68_s22 }
  0x27   :  { %s1061_s27 = scalar_lea.hbm %s1417_s5, 1024 }
  0x28   :  { %p1062_p2 = scmp.ne.s32.totalorder %s1417_s5, %s1061_s27  ;;  %p1065_p3 = scmp.lt.u32.totalorder %s1061_s27, %s1417_s5 }
  0x2a   :  { %p1067_p4 = pnand %p1065_p3, %p1062_p2 }
  0x2c   :  { %1070 = shalt.err (!%p1067_p4)
}
  0x2d   :  { %s1071_s2 = scalar_lea.vmem %s57_s20, 1024  ;;  %p1076_p6 = scmp.lt.s32.totalorder %s57_s20, %s57_s20 }
  0x2e   :  { %p1072_p5 = scmp.ne.s32.totalorder %s57_s20, %s1071_s2  ;;  %p1077_p7 = scmp.lt.s32.totalorder %s1071_s2, %s1071_s2 }
  0x30   :  { %p1078_p8 = por %p1077_p7, %p1076_p6 }
  0x32   :  { %p1079_p9 = pnand %p1078_p8, %p1072_p5 }
  0x34   :  { %1082 = shalt.err (!%p1079_p9)
}
  0x35   :  { %62 = dma.hbm_to_vmem [thread:$0]  %s1417_s5, 1024, %s57_s20, [#allocation6], %s1161_s25, %s1161_s25, %s1162_s26  }
  0x36   :  { %s1083_s17 = scalar_lea.hbm %s1418_s6, 1024 }
  0x37   :  { %p1084_p10 = scmp.ne.s32.totalorder %s1418_s6, %s1083_s17  ;;  %p1087_p11 = scmp.lt.u32.totalorder %s1083_s17, %s1418_s6 }
  0x39   :  { %p1089_p12 = pnand %p1087_p11, %p1084_p10 }
  0x3b   :  { %1092 = shalt.err (!%p1089_p12)
}
  0x3c   :  { %s1093_s21 = scalar_lea.vmem %s1268_s22, 1024  ;;  %p1098_p0 = scmp.lt.s32.totalorder %s1268_s22, %s1268_s22 }
  0x3d   :  { %p1094_p13 = scmp.ne.s32.totalorder %s1268_s22, %s1093_s21  ;;  %p1099_p1 = scmp.lt.s32.totalorder %s1093_s21, %s1093_s21 }
  0x3f   :  { %p1100_p2 = por %p1099_p1, %p1098_p0 }
  0x41   :  { %p1101_p3 = pnand %p1100_p2, %p1094_p13 }
  0x43   :  { %1104 = shalt.err (!%p1101_p3)
}
  0x44   :  { %74 = dma.hbm_to_vmem [thread:$0]  %s1418_s6, 1024, %s1268_s22, [#allocation9], %s1161_s25, %s1161_s25, %s1162_s26  }
  0x45   :  { %1149 = dma.done.wait [#allocation3], 1024  }
  0x46   :  { %1150 = vsyncadd [#allocation3], 4294966272 }
  0x47   :  { %1151 = dma.done.wait [#allocation6], 2048  }
  0x48   :  { %1152 = vsyncadd [#allocation6], 4294965248 }
  0x49   :  { %1153 = dma.done.wait [#allocation9], 1024  }
  0x4a   :  { %1154 = vsyncadd [#allocation9], 4294966272  ;;  %v1165_v0 = vmov 0   ;;  %v92_v1 = vld [vmem:[%s1412_s0] sm:$0xff]  ;;  %v977_v2 = vld [vmem:[#allocation5] sm:$0xff]   ;;  %v1166_v4 = vmov 0.0  }
  0x4b   :  { %976 = vset.pattern.permute.xlu0 %v1165_v0  ;;  %v978_v3 = vld [vmem:[#allocation2] sm:$0xff]   ;;  %875 = vmatprep.subr.bf16.mxu0 %v1166_v4  ;;  %v979_v5 = vld [vmem:[#allocation5 + $0x8] sm:$0xff]   ;;  %v981_v7 = vld [vmem:[#allocation5 + $0x10] sm:$0xff]   ;;  %vm1167_vm0 = vmmov 0   ;;  %v1168_v32 = vmov 683565275  }
  0x4c   :  { %96 = vperm.xlu0 %976, %v92_v1   ;;  %895 = vmatprep.subr.bf16.mxu1 %v1166_v4  ;;  %v980_v6 = vld [vmem:[#allocation2 + $0x8] sm:$0xff]   ;;  %v982_v8 = vld [vmem:[#allocation2 + $0x10] sm:$0xff]   ;;  %v983_v9 = vld [vmem:[#allocation5 + $0x18] sm:$0xff]   ;;  %v1169_v34 = vmov 2475754826   ;;  %s1174_s28 = smov [#allocation10]  }
  0x4d   :  { %876 = vmatpush3.bf16.msra.mxu0 %v977_v2  ;;  %896 = vmatpush3.bf16.msra.mxu1 %v978_v3  ;;  %v984_v10 = vld [vmem:[#allocation2 + $0x18] sm:$0xff]   ;;  %v985_v11 = vld [vmem:[#allocation5 + $0x20] sm:$0xff]   ;;  %v987_v13 = vld [vmem:[#allocation5 + $0x28] sm:$0xff]   ;;  %v1170_v37 = vmov 2131351028   ;;  %s769_s29 = sshll.u32 %s1174_s28, 4  ;;  %s770_s29 = int_to_ptr.vmem [resolvable:$true] %s769_s29 }
  0x4e   :  { %877 = vmatprep.subr.bf16.mxu0 %v1166_v4  ;;  %897 = vmatprep.subr.bf16.mxu1 %v1166_v4  ;;  %v986_v12 = vld [vmem:[#allocation2 + $0x20] sm:$0xff]   ;;  %v988_v14 = vld [vmem:[#allocation2 + $0x28] sm:$0xff]   ;;  %v989_v15 = vld [vmem:[#allocation5 + $0x30] sm:$0xff]   ;;  %v1171_v40 = vmov 2102212464   ;;  %s1175_s30 = smov [#allocation11]   ;;  %p1110_p5 = scmp.lt.s32.totalorder %s770_s29, %s770_s29 }
  0x4f   :  { %891 = vmatprep.mubr.msk.bf16.mxu0 %vm1167_vm0, %v1166_v4  ;;  %911 = vmatprep.mubr.msk.bf16.mxu1 %vm1167_vm0, %v1166_v4  ;;  %v990_v16 = vld [vmem:[#allocation2 + $0x30] sm:$0xff]   ;;  %v991_v17 = vld [vmem:[#allocation5 + $0x38] sm:$0xff]   ;;  %v1172_v43 = vmov 920167782   ;;  %v1173_v46 = vmov 1326507024  }
  0x50   :  { %v992_v18 = vld [vmem:[#allocation2 + $0x38] sm:$0xff]   ;;  %s779_s11 = sshll.u32 %s1175_s30, 4  ;;  %s1381_s11 = int_to_ptr.vmem [resolvable:$true] %s779_s11 }
  0x51   :  { %878 = vmatpush3.bf16.msra.mxu0 %v979_v5  ;;  %898 = vmatpush3.bf16.msra.mxu1 %v980_v6  ;;  %v794_v19 = vld [vmem:[%s1413_s1] ss:$0 sm:$0xff] }
  0x52   :  { %879 = vmatprep.subr.bf16.mxu0 %v1166_v4  ;;  %899 = vmatprep.subr.bf16.mxu1 %v1166_v4 }
  0x55   :  { %880 = vmatpush3.bf16.msra.mxu0 %v981_v7  ;;  %900 = vmatpush3.bf16.msra.mxu1 %v982_v8 }
  0x56   :  { %881 = vmatprep.subr.bf16.mxu0 %v1166_v4  ;;  %901 = vmatprep.subr.bf16.mxu1 %v1166_v4 }
  0x59   :  { %882 = vmatpush3.bf16.msra.mxu0 %v983_v9  ;;  %902 = vmatpush3.bf16.msra.mxu1 %v984_v10 }
  0x5a   :  { %883 = vmatprep.subr.bf16.mxu0 %v1166_v4  ;;  %903 = vmatprep.subr.bf16.mxu1 %v1166_v4 }
  0x5d   :  { %884 = vmatpush3.bf16.msra.mxu0 %v985_v11  ;;  %904 = vmatpush3.bf16.msra.mxu1 %v986_v12 }
  0x5e   :  { %885 = vmatprep.subr.bf16.mxu0 %v1166_v4  ;;  %905 = vmatprep.subr.bf16.mxu1 %v1166_v4 }
  0x61   :  { %886 = vmatpush3.bf16.msra.mxu0 %v987_v13  ;;  %906 = vmatpush3.bf16.msra.mxu1 %v988_v14 }
  0x62   :  { %887 = vmatprep.subr.bf16.mxu0 %v1166_v4  ;;  %907 = vmatprep.subr.bf16.mxu1 %v1166_v4 }
  0x65   :  { %888 = vmatpush3.bf16.msra.mxu0 %v989_v15  ;;  %908 = vmatpush3.bf16.msra.mxu1 %v990_v16 }
  0x66   :  { %889 = vmatprep.subr.bf16.mxu0 %v1166_v4  ;;  %909 = vmatprep.subr.bf16.mxu1 %v1166_v4 }
  0x69   :  { %890 = vmatpush3.bf16.msra.mxu0 %v991_v17  ;;  %910 = vmatpush3.bf16.msra.mxu1 %v992_v18 }
  0x6a   :  { %915 = vmatprep.subr.bf16.mxu0 %v1166_v4  ;;  %935 = vmatprep.subr.bf16.mxu1 %v1166_v4 }
  0xcb   :  { %v97_v20 = vpop.permute.xlu0 %96 }
  0xcc   :  { %v1333_v21 = vmul.f32 %v794_v19, %v97_v20 }
  0xce   :  { %v109_v22 = vand.u32 2139095040, %v1333_v21  ;;  %v106_v26 = vand.u32 2147483647, %v1333_v21  ;;  %vm108_vm8 = vcmp.lt.s32.totalorder %v1333_v21, 0 }
  0xd0   :  { %v110_v23 = vshrl.u32 %v109_v22, 23  ;;  %v113_v29 = vand.u32 8388607, %v106_v26  ;;  %vm107_vm9 = vcmp.le.f32.partialorder %v106_v26, 0.7853982 }
  0xd2   :  { %v795_v24 = vadd.s32 4294967169, %v110_v23  ;;  %v114_v48 = vor.u32 8388608, %v113_v29 }
  0xd4   :  { %v116_v25 = vadd.s32 1, %v795_v24  ;;  %v154_v62 = vshll.u32 %v114_v48, 8 }
  0xd6   :  { %vm117_vm1 = vcmp.gt.s32.totalorder %v116_v25, 0 }
  0xd7   :  { %v118_v27 = vsel %vm117_vm1, %v116_v25, 0  ;;  %vm198_vm1 = vweird.f32 %v1333_v21 }
  0xd8   :  { %v120_v28 = vand.u32 31, %v118_v27  ;;  %v119_v31 = vshrl.u32 %v118_v27, 5 }
  0xda   :  { %v121_v30 = vsub.s32 32, %v120_v28  ;;  %v123_v33 = vshll.u32 %v1168_v32, %v120_v28  ;;  %v126_v35 = vshll.u32 %v1169_v34, %v120_v28  ;;  %v129_v39 = vshll.u32 %v1170_v37, %v120_v28 }
  0xdb   :  { %v132_v42 = vshll.u32 %v1171_v40, %v120_v28  ;;  %v135_v45 = vshll.u32 %v1172_v43, %v120_v28  ;;  %vm138_vm2 = vcmp.lt.s32.totalorder %v119_v31, 1  ;;  %vm141_vm3 = vcmp.lt.s32.totalorder %v119_v31, 4 }
  0xdc   :  { %v124_v36 = vshrl.u32 %v1169_v34, %v121_v30  ;;  %v127_v38 = vshrl.u32 %v1170_v37, %v121_v30  ;;  %v130_v41 = vshrl.u32 %v1171_v40, %v121_v30  ;;  %v133_v44 = vshrl.u32 %v1172_v43, %v121_v30 }
  0xdd   :  { %v136_v47 = vshrl.u32 %v1173_v46, %v121_v30  ;;  %v122_v57 = vshrl.u32 %v1168_v32, %v121_v30  ;;  %vm140_vm4 = vcmp.lt.s32.totalorder %v119_v31, 3  ;;  %vm139_vm5 = vcmp.lt.s32.totalorder %v119_v31, 2 }
  0xde   :  { %v125_v49 = vor.u32 %v124_v36, %v123_v33  ;;  %v128_v50 = vor.u32 %v127_v38, %v126_v35  ;;  %v131_v51 = vor.u32 %v130_v41, %v129_v39  ;;  %v134_v52 = vor.u32 %v133_v44, %v132_v42 }
  0xdf   :  { %v137_v53 = vor.u32 %v136_v47, %v135_v45 }
  0xe0   :  { %v143_v54 = vsel %vm141_vm3, %v131_v51, 2102212464  ;;  %v146_v55 = vsel %vm138_vm2, %v125_v49, %v128_v50  ;;  %v150_v56 = vsel %vm138_vm2, %v128_v50, %v131_v51  ;;  %v147_v58 = vsel %vm141_vm3, %v134_v52, 920167782 }
  0xe1   :  { %v151_v59 = vsel %vm141_vm3, %v137_v53, 1326507024  ;;  %v148_v60 = vsel %vm140_vm4, %v131_v51, %v147_v58  ;;  %v142_v63 = vsel %vm138_vm2, %v122_v57, %v125_v49  ;;  %v144_v0 = vsel %vm140_vm4, %v128_v50, %v143_v54  ;;  %v993_v58 = vld [vmem:[#allocation7] sm:$0xff]  }
  0xe2   :  { %v152_v61 = vsel %vm140_vm4, %v134_v52, %v151_v59  ;;  %v149_v1 = vsel %vm139_vm5, %v146_v55, %v148_v60  ;;  %v145_v8 = vsel %vm139_vm5, %v142_v63, %v144_v0  ;;  %v994_v59 = vld [vmem:[#allocation8] sm:$0xff]   ;;  %v996_v60 = vld [vmem:[#allocation8 + $0x8] sm:$0xff]   ;;  %v999_v63 = vld [vmem:[#allocation7 + $0x18] sm:$0xff]  }
  0xe3   :  { %v153_v2 = vsel %vm139_vm5, %v150_v56, %v152_v61  ;;  %v1342_v6 = vmul.u32.u64.low %v154_v62, %v149_v1  ;;  %v1343_v7 = vmul.u32.u64.high %v154_v62, %v149_v1, %v1342_v6  ;;  %v161_v10 = vmul.u32 %v154_v62, %v145_v8  ;;  %v997_v61 = vld [vmem:[#allocation7 + $0x10] sm:$0xff]   ;;  %v1000_v0 = vld [vmem:[#allocation8 + $0x18] sm:$0xff]   ;;  %v1001_v1 = vld [vmem:[#allocation7 + $0x20] sm:$0xff]  }
  0xe4   :  { %v1339_v3 = vmul.u32.u64.low %v154_v62, %v153_v2  ;;  %v1340_v5 = vmul.u32.u64.high %v154_v62, %v153_v2, %v1339_v3  ;;  %v998_v62 = vld [vmem:[#allocation8 + $0x10] sm:$0xff]   ;;  %v1002_v2 = vld [vmem:[#allocation8 + $0x20] sm:$0xff]   ;;  %v1007_v8 = vld [vmem:[#allocation7 + $0x38] sm:$0xff]  }
  0xe5   :  { %v164_v9 = vadd.s32 1, %v1343_v7  ;;  %v1003_v3 = vld [vmem:[#allocation7 + $0x28] sm:$0xff]  }
  0xe6   :  { %vm163_vm6 = vc.u32 %v1340_v5, %v1342_v6  ;;  %v162_v23 = vadd.s32 %v1342_v6, %v1340_v5  ;;  %v1004_v5 = vld [vmem:[#allocation8 + $0x28] sm:$0xff]   ;;  %v1005_v6 = vld [vmem:[#allocation7 + $0x30] sm:$0xff]  }
  0xe7   :  { %v165_v11 = vsel %vm163_vm6, %v164_v9, %v1343_v7  ;;  %v1006_v7 = vld [vmem:[#allocation8 + $0x30] sm:$0xff]   ;;  %v1008_v9 = vld [vmem:[#allocation8 + $0x38] sm:$0xff]  }
  0xe8   :  { %v166_v12 = vadd.s32 %v165_v11, %v161_v10 }
  0xea   :  { %v167_v13 = vadd.s32 536870912, %v166_v12 }
  0xec   :  { %v168_v14 = vshrl.u32 %v167_v13, 30 }
  0xee   :  { %v169_v15 = vshll.u32 %v168_v14, 30  ;;  %v192_v36 = vsub.s32 4, %v168_v14 }
  0xf0   :  { %v170_v16 = vsub.s32 %v166_v12, %v169_v15  ;;  %v193_v39 = vsel %vm108_vm8, %v192_v36, %v168_v14  ;;  %v819_v12 = vld [vmem:[%s1416_s4] ss:$0 sm:$0xff] }
  0xf1   :  { %v195_v41 = vsel %vm107_vm9, 0, %v193_v39 }
  0xf2   :  { %v172_v17 = vsub.s32 0, %v170_v16  ;;  %v199_v42 = vadd.s32 3, %v195_v41  ;;  %v303_v43 = vand.u32 3, %v195_v41 }
  0xf4   :  { %v796_v18 = vmin.u32 %v172_v17, %v170_v16  ;;  %v200_v44 = vand.u32 3, %v199_v42  ;;  %vm308_vm10 = vcmp.eq.s32.totalorder %v303_v43, 2  ;;  %vm305_vm12 = vcmp.eq.s32.totalorder %v303_v43, 0 }
  0xf5   :  { %vm304_vm14 = vcmp.lt.s32.totalorder %v303_v43, 2 }
  0xf6   :  { %v174_v19 = vclz %v796_v18  ;;  %vm205_vm11 = vcmp.eq.s32.totalorder %v200_v44, 2  ;;  %vm202_vm13 = vcmp.eq.s32.totalorder %v200_v44, 0  ;;  %vm201_vm15 = vcmp.lt.s32.totalorder %v200_v44, 2 }
  0xf8   :  { %v797_v20 = vadd.s32 4294967294, %v174_v19 }
  0xfa   :  { %vm798_vm7 = vcmp.lt.s32.totalorder %v797_v20, 0 }
  0xfb   :  { %v177_v22 = vsel %vm798_vm7, 0, %v797_v20 }
  0xfc   :  { %v178_v24 = vsub.s32 32, %v177_v22  ;;  %v182_v25 = vsub.s32 4294967266, %v177_v22  ;;  %v179_v27 = vshll.u32 %v170_v16, %v177_v22 }
  0xfe   :  { %v180_v28 = vshrl.u32 %v162_v23, %v178_v24  ;;  %v183_v29 = vadd.s32 127, %v182_v25 }
 0x100   :  { %v181_v30 = vor.u32 %v180_v28, %v179_v27  ;;  %v184_v31 = vshll.u32 %v183_v29, 23  ;;  %v821_v28 = vld [vmem:[%s1419_s7] ss:$0 sm:$0xff]  ;;  %s1105_s7 = scalar_lea.vmem %s770_s29, 128 }
 0x101   :  { %v830_v29 = vld [vmem:[%s1420_s8] ss:$0 sm:$0xff]  ;;  %p1106_p4 = scmp.ne.s32.totalorder %s770_s29, %s1105_s7  ;;  %p1111_p6 = scmp.lt.s32.totalorder %s1105_s7, %s1105_s7 }
 0x102   :  { %v185_v32 = vor.u32 4788187, %v184_v31  ;;  %v188_v34 = vcvt.s32.f32 %v181_v30 }
 0x103   :  { %p1112_p7 = por %p1111_p6, %p1110_p5 }
 0x104   :  { %v186_v33 = vand.u32 2147483647, %v185_v32 }
 0x105   :  { %p1113_p8 = pnand %p1112_p7, %p1106_p4 }
 0x106   :  { %v189_v35 = vmul.f32 %v188_v34, %v186_v33 }
 0x108   :  { %v190_v37 = vxor.u32 2147483648, %v189_v35 }
 0x10a   :  { %v191_v38 = vsel %vm108_vm8, %v190_v37, %v189_v35 }
 0x10b   :  { %v194_v40 = vsel %vm107_vm9, %v1333_v21, %v191_v38  ;;  %v995_v21 = vld [vmem:[#allocation7 + $0x8] sm:$0xff]  }
 0x10c   :  { %1009 = vcosq.f32 %v194_v40 }
 0x10d   :  { %1011 = vsinq.f32 %v194_v40 }
 0x116   :  { %v1010_v45 = vpop.eup %1009 }
 0x117   :  { %v1012_v46 = vpop.eup %1011  ;;  %v206_v47 = vxor.u32 2147483648, %v1010_v45 }
 0x118   :  { %v203_v48 = vxor.u32 2147483648, %v1012_v46 }
 0x119   :  { %v310_v49 = vsel %vm308_vm10, %v206_v47, %v1012_v46  ;;  %v207_v26 = vsel %vm205_vm11, %v206_v47, %v1012_v46 }
 0x11a   :  { %v307_v50 = vsel %vm305_vm12, %v1010_v45, %v203_v48  ;;  %v204_v51 = vsel %vm202_vm13, %v1010_v45, %v203_v48 }
 0x11b   :  { %v311_v52 = vsel %vm304_vm14, %v307_v50, %v310_v49  ;;  %v208_v53 = vsel %vm201_vm15, %v204_v51, %v207_v26 }
 0x11c   :  { %v312_v54 = vsel %vm198_vm1, nan, %v311_v52  ;;  %v209_v55 = vsel %vm198_vm1, nan, %v208_v53 }
 0x11d   :  { %v330_v56 = vpack.c.bf16 %v312_v54, %v312_v54  ;;  %v313_v57 = vpack.c.bf16 %v209_v55, %v209_v55 }
 0x11f   :  { %892 = vmatmul.mubr.bf16.vlgmr.msra.gmra.mrb[0].mxu0 %v330_v56  ;;  %912 = vmatmul.mubr.bf16.vlgmr.msra.gmra.mrb[0].mxu1 %v313_v57 }
 0x120   :  { %931 = vmatprep.mubr.msk.bf16.mxu0 %vm1167_vm0, %v1166_v4  ;;  %951 = vmatprep.mubr.msk.bf16.mxu1 %vm1167_vm0, %v1166_v4 }
 0x121   :  { %916 = vmatpush3.bf16.msra.mxu0 %v993_v58  ;;  %936 = vmatpush3.bf16.msra.mxu1 %v994_v59 }
 0x122   :  { %917 = vmatprep.subr.bf16.mxu0 %v1166_v4  ;;  %937 = vmatprep.subr.bf16.mxu1 %v1166_v4 }
 0x125   :  { %918 = vmatpush3.bf16.msra.mxu0 %v995_v21  ;;  %938 = vmatpush3.bf16.msra.mxu1 %v996_v60 }
 0x126   :  { %919 = vmatprep.subr.bf16.mxu0 %v1166_v4  ;;  %939 = vmatprep.subr.bf16.mxu1 %v1166_v4 }
 0x129   :  { %920 = vmatpush3.bf16.msra.mxu0 %v997_v61  ;;  %940 = vmatpush3.bf16.msra.mxu1 %v998_v62 }
 0x12a   :  { %921 = vmatprep.subr.bf16.mxu0 %v1166_v4  ;;  %941 = vmatprep.subr.bf16.mxu1 %v1166_v4 }
 0x12d   :  { %922 = vmatpush3.bf16.msra.mxu0 %v999_v63  ;;  %942 = vmatpush3.bf16.msra.mxu1 %v1000_v0 }
 0x12e   :  { %923 = vmatprep.subr.bf16.mxu0 %v1166_v4  ;;  %943 = vmatprep.subr.bf16.mxu1 %v1166_v4 }
 0x131   :  { %924 = vmatpush3.bf16.msra.mxu0 %v1001_v1  ;;  %944 = vmatpush3.bf16.msra.mxu1 %v1002_v2 }
 0x132   :  { %925 = vmatprep.subr.bf16.mxu0 %v1166_v4  ;;  %945 = vmatprep.subr.bf16.mxu1 %v1166_v4 }
 0x135   :  { %926 = vmatpush3.bf16.msra.mxu0 %v1003_v3  ;;  %946 = vmatpush3.bf16.msra.mxu1 %v1004_v5 }
 0x136   :  { %927 = vmatprep.subr.bf16.mxu0 %v1166_v4  ;;  %947 = vmatprep.subr.bf16.mxu1 %v1166_v4 }
 0x139   :  { %928 = vmatpush3.bf16.msra.mxu0 %v1005_v6  ;;  %948 = vmatpush3.bf16.msra.mxu1 %v1006_v7 }
 0x13a   :  { %929 = vmatprep.subr.bf16.mxu0 %v1166_v4  ;;  %949 = vmatprep.subr.bf16.mxu1 %v1166_v4 }
 0x13d   :  { %930 = vmatpush3.bf16.msra.mxu0 %v1007_v8  ;;  %950 = vmatpush3.bf16.msra.mxu1 %v1008_v9 }
 0x1f2   :  { %v429_v10 = vpop.f32.mrb[0].mxu0  ;;  %v517_v11 = vpop.f32.mrb[0].mxu1 }
 0x1f3   :  { %v518_v13 = vadd.f32 %v517_v11, %v429_v10  ;;  %v893_v14 = vpop.f32.mrb[1].mxu0  ;;  %v913_v15 = vpop.f32.mrb[1].mxu1 }
 0x1f4   :  { %v432_v16 = vpop.f32.mrb[2].mxu0  ;;  %v520_v17 = vpop.f32.mrb[2].mxu1 }
 0x1f5   :  { %v530_v18 = vadd.f32 %v819_v12, %v518_v13  ;;  %v894_v19 = vpop.f32.mrb[3].mxu0  ;;  %v914_v20 = vpop.f32.mrb[3].mxu1 }
 0x1f7   :  { %v820_v22 = vmul.f32 -1.442695, %v530_v18 }
 0x1f9   :  { %1013 = vpow2.f32 %v820_v22 }
 0x203   :  { %v1014_v4 = vpop.eup %1013 }
 0x204   :  { %v534_v23 = vadd.f32 1.0, %v1014_v4 }
 0x206   :  { %1015 = vrcp.f32 %v534_v23 }
 0x210   :  { %v1016_v24 = vpop.eup %1015 }
 0x211   :  { %v537_v25 = vmul.f32 %v1016_v24, %v530_v18 }
 0x213   :  { %v538_v27 = vpack.c.bf16 %v537_v25, %v537_v25 }
 0x215   :  { %932 = vmatmul.mubr.bf16.vlgmr.msra.gmra.mrb[4].mxu0 %v538_v27  ;;  %952 = vmatmul.mubr.bf16.vlgmr.msra.gmra.mrb[4].mxu1 %v538_v27 }
 0x2e8   :  { %v644_v30 = vpop.f32.mrb[4].mxu0  ;;  %v755_v31 = vpop.f32.mrb[4].mxu1 }
 0x2e9   :  { %v645_v32 = vadd.f32 %v821_v28, %v644_v30  ;;  %v756_v33 = vadd.f32 %v830_v29, %v755_v31  ;;  %v933_v34 = vpop.f32.mrb[5].mxu0  ;;  %v953_v35 = vpop.f32.mrb[5].mxu1 }
 0x2ea   :  { %v647_v36 = vpop.f32.mrb[6].mxu0  ;;  %v758_v37 = vpop.f32.mrb[6].mxu1 }
 0x2eb   :  { %761 = vst [vmem:[#allocation10] sm:$0xff] %v645_v32  ;;  %762 = vst [vmem:[#allocation11] sm:$0xff] %v756_v33  ;;  %v934_v38 = vpop.f32.mrb[7].mxu0  ;;  %v954_v39 = vpop.f32.mrb[7].mxu1 }
 0x2ec   :  { %1116 = shalt.err (!%p1113_p8)
}
 0x2ed   :  { %s1117_s16 = scalar_lea.hbm %s1421_s9, 128 }
 0x2ee   :  { %p1118_p9 = scmp.ne.s32.totalorder %s1421_s9, %s1117_s16  ;;  %p1121_p10 = scmp.lt.u32.totalorder %s1117_s16, %s1421_s9 }
 0x2f0   :  { %p1123_p11 = pnand %p1121_p10, %p1118_p9 }
 0x2f2   :  { %1126 = shalt.err (!%p1123_p11)
}
 0x2f3   :  { %772 = dma.vmem_to_hbm [thread:$0]  %s770_s29, 128, %s1421_s9, [#allocation4]  }
 0x2f4   :  { %s1127_s14 = scalar_lea.vmem %s1381_s11, 128  ;;  %p1132_p13 = scmp.lt.s32.totalorder %s1381_s11, %s1381_s11 }
 0x2f5   :  { %p1128_p12 = scmp.ne.s32.totalorder %s1381_s11, %s1127_s14  ;;  %p1133_p0 = scmp.lt.s32.totalorder %s1127_s14, %s1127_s14 }
 0x2f7   :  { %p1134_p1 = por %p1133_p0, %p1132_p13 }
 0x2f9   :  { %p1135_p2 = pnand %p1134_p1, %p1128_p12 }
 0x2fb   :  { %1138 = shalt.err (!%p1135_p2)
}
 0x2fc   :  { %s1139_s5 = scalar_lea.hbm %s1422_s10, 128 }
 0x2fd   :  { %p1140_p3 = scmp.ne.s32.totalorder %s1422_s10, %s1139_s5  ;;  %p1143_p4 = scmp.lt.u32.totalorder %s1139_s5, %s1422_s10 }
 0x2ff   :  { %p1145_p5 = pnand %p1143_p4, %p1140_p3 }
 0x301   :  { %1148 = shalt.err (!%p1145_p5)
}
 0x302   :  { %782 = dma.vmem_to_hbm [thread:$0]  %s1381_s11, 128, %s1422_s10, [#allocation12]  }
 0x303   :  { %1155 = dma.done.wait [#allocation4], 128  }
 0x304   :  { %1156 = vsyncadd [#allocation4], 4294967168 }
 0x305   :  { %1157 = dma.done.wait [#allocation12], 128  }
 0x306   :  { %1158 = vsyncadd [#allocation12], 4294967168 }
 0x307   :  { %789 = vsyncpa [#allocation3], 1 }
 0x308   :  { %790 = vsyncpa [#allocation6], 1 }
 0x309   :  { %791 = vsyncpa [#allocation9], 1 }
 0x30a   :  { %792 = vsyncpa [#allocation4], 1 }
 0x30b   :  { %793 = vsyncpa [#allocation12], 1 }

</bundles_post_ra>
